<compile_context>
chip_gen: v7x
topology: tpu7x:2x2x1
jax: 0.10.0
libtpu: 0.0.40
codegen_flags: <defaults>
</compile_context>

<pallas_src>
import functools

import jax
import jax.numpy as jnp
import numpy as np
from jax import lax
from jax.experimental import pallas as pl
from jax.experimental.pallas import tpu as pltpu

LRELU_SLOPE = 0.1


def _round_up(x, m):
    return (x + m - 1) // m * m


def _chain_halo(kernel_size, dilations):
    """One-sided receptive-field growth of one ResBlock1 conv chain."""
    # NOTE: 'same' padding (K-1)*d//2 is only symmetric for odd K (3/7/11 in
    # canonical HiFi-GAN).
    return sum((kernel_size - 1) * d // 2 + (kernel_size - 1) // 2
               for d in dilations)


# ----------------------------------------------------------------------------
# Fused MRF kernel: one (batch, time-tile) grid step computes every ResBlock
# chain on a halo'd window and writes the averaged output tile.
# ----------------------------------------------------------------------------
def _mrf_kernel(*args, blocks, n_ch, t_len, t_tile, halo, slope):
    """args = (x_ref, w_ref_0, b_ref_0, ..., w_ref_{R-1}, b_ref_{R-1}, out_ref)

    x_ref   : (n_ch, t_tile + 2*halo)  halo'd input window (zero outside [0,T))
    w_ref_r : (2*n_pairs_r, n_ch, K_r*n_ch)  im2col-reshaped conv weights
    b_ref_r : (2*n_pairs_r, n_ch, 1)         conv biases (float32)
    out_ref : (n_ch, t_tile)                 mean over ResBlocks of resblock(x)
    """
    x_ref = args[0]
    out_ref = args[-1]
    wb_refs = args[1:-1]

    j = pl.program_id(1)                 # time-tile index
    g0 = j * t_tile - halo               # global time index of window column 0

    def lrelu(v):
        return jnp.where(v > 0, v, slope * v)

    def in_range(width, off):
        # Mask of global positions inside [0, t_len) for a window of `width`
        # columns whose first column sits at global index g0 + off.
        idx = lax.broadcasted_iota(jnp.int32, (n_ch, width), 1) + (g0 + off)
        return (idx >= 0) & (idx < t_len)

    def conv_valid(a, w2d, bias, kernel_size, dilation):
        # a: (n_ch, W) activation; w2d: (n_ch, K*n_ch); bias: (n_ch, 1) f32.
        w_out = a.shape[-1] - (kernel_size - 1) * dilation
        cols = [a[:, k * dilation:k * dilation + w_out]
                for k in range(kernel_size)]
        im = jnp.concatenate(cols, axis=0)            # (K*n_ch, w_out)
        y = jnp.dot(w2d, im, preferred_element_type=jnp.float32)
        return y + bias                               # float32 (n_ch, w_out)

    xw = x_ref[...]
    cdt = xw.dtype
    acc = jnp.zeros((n_ch, t_tile), jnp.float32)

    for r, (kernel_size, dils) in enumerate(blocks):
        w_ref = wb_refs[2 * r]
        b_ref = wb_refs[2 * r + 1]
        h = xw                    # current activation, window offset 0
        off = 0                   # cumulative one-sided shrink of the window
        for i, d in enumerate(dils):
            p1 = (kernel_size - 1) * d // 2
            p2 = (kernel_size - 1) // 2
            # xt = c1(leaky_relu(h))  (dilation d, 'same' zero padding)
            t_val = conv_valid(lrelu(h), w_ref[2 * i], b_ref[2 * i],
                               kernel_size, d)
            off1 = off + p1
            t_val = jnp.where(in_range(t_val.shape[-1], off1), t_val, 0.0)
            # xt = c2(leaky_relu(xt)) (dilation 1, 'same' zero padding)
            u = conv_valid(lrelu(t_val.astype(cdt)), w_ref[2 * i + 1],
                           b_ref[2 * i + 1], kernel_size, 1)
            off2 = off1 + p2
            w2 = u.shape[-1]
            # h = xt + h  on the matching centre slice of h.
            shift = off2 - off
            h_c = h[:, shift:shift + w2].astype(jnp.float32)
            h = jnp.where(in_range(w2, off2), u + h_c, 0.0).astype(cdt)
            off = off2
        # Centre t_tile columns of this resblock output (global [j*TT, j*TT+TT)).
        start = halo - off
        acc = acc + h[:, start:start + t_tile].astype(jnp.float32)

    out_ref[...] = (acc * (1.0 / len(blocks))).astype(out_ref.dtype)


# ----------------------------------------------------------------------------
# Wrapper
# ----------------------------------------------------------------------------
def mrf_forward(x, params, slope=LRELU_SLOPE, *, time_tile=512,
                compute_dtype=None):
    """MultiReceptiveFieldFusion.forward = mean over ResBlock1(x) outputs."""
    B, C, T = x.shape
    cdt = jnp.dtype(compute_dtype) if compute_dtype is not None else x.dtype

    # Static per-resblock config + fused, MXU-friendly weight/bias operands.
    blocks = []
    operands = []
    for blk in params:
        convs1, convs2 = blk["convs1"], blk["convs2"]
        K = convs1[0][0].shape[-1]
        dils = tuple(int(d) for (_, _, d) in convs1)
        ws, bs = [], []
        for (w1, b1, _), (w2, b2) in zip(convs1, convs2):
            for w, b in ((w1, b1), (w2, b2)):
                # (Co, Ci, K) -> (Co, K*Ci): tap axis off the lane dimension.
                ws.append(jnp.transpose(w, (0, 2, 1)).reshape(C, K * C))
                bs.append(b.reshape(C, 1))
        blocks.append((K, dils))
        operands.append(jnp.stack(ws).astype(cdt))          # (2P, C, K*C)
        operands.append(jnp.stack(bs).astype(jnp.float32))   # (2P, C, 1)
    blocks = tuple(blocks)

    halo = max(_chain_halo(K, dils) for (K, dils) in blocks)
    t_tile = _round_up(min(time_tile, _round_up(T, 128)), 128)
    n_tiles = -(-T // t_tile)
    t_pad = n_tiles * t_tile
    t_win = t_tile + 2 * halo

    # Pad ONCE for the whole fused chain, then build halo'd time windows so
    # every grid step reads a plain non-overlapping block (one cheap pass over
    # x only, vs. a pad + full HBM round trip per conv before).
    xpad = jnp.pad(x, ((0, 0), (0, 0), (halo, (t_pad - T) + halo)))
    xwin = jnp.stack(
        [xpad[:, :, j * t_tile:j * t_tile + t_win] for j in range(n_tiles)],
        axis=1).astype(cdt)                                  # (B, NT, C, TW)

    kernel = functools.partial(
        _mrf_kernel, blocks=blocks, n_ch=C, t_len=T, t_tile=t_tile,
        halo=halo, slope=slope)

    in_specs = [pl.BlockSpec((None, None, C, t_win), lambda b, j: (b, j, 0, 0))]
    for op in operands:
        in_specs.append(pl.BlockSpec(op.shape, lambda b, j: (0, 0, 0)))

    out = pl.pallas_call(
        kernel,
        out_shape=jax.ShapeDtypeStruct((B, C, t_pad), x.dtype),
        grid_spec=pltpu.PrefetchScalarGridSpec(
            num_scalar_prefetch=0,
            grid=(B, n_tiles),
            in_specs=in_specs,
            out_specs=pl.BlockSpec((None, C, t_tile), lambda b, j: (b, 0, j)),
        ),
        compiler_params=pltpu.CompilerParams(
            dimension_semantics=("parallel", "parallel")),
    )(xwin, *operands)

    return out[:, :, :T] if t_pad != T else out


# ----------------------------------------------------------------------------
# Deterministic parameter init (synthetic; mirrors Conv1d(C, C, k) shapes)
# ----------------------------------------------------------------------------
def init_params(key, n_channels, kernel_sizes, dilation_sizes):
    params = []
    for ks, dils in zip(kernel_sizes, dilation_sizes):
        convs1, convs2 = [], []
        for d in dils:
            key, k1, k2, k3, k4 = jax.random.split(key, 5)
            w1 = 0.1 * jax.random.normal(k1, (n_channels, n_channels, ks), jnp.float32)
            b1 = 0.1 * jax.random.normal(k2, (n_channels,), jnp.float32)
            w2 = 0.1 * jax.random.normal(k3, (n_channels, n_channels, ks), jnp.float32)
            b2 = 0.1 * jax.random.normal(k4, (n_channels,), jnp.float32)
            convs1.append((w1, b1, d))
            convs2.append((w2, b2))
        params.append({"convs1": convs1, "convs2": convs2})
    return params


# ----------------------------------------------------------------------------
# Pure-JAX reference (for correctness check)
# ----------------------------------------------------------------------------
def _ref_conv(x, w, b, dilation):
    pad = (w.shape[-1] - 1) * dilation // 2
    y = lax.conv_general_dilated(
        x, w, window_strides=(1,), padding=[(pad, pad)],
        rhs_dilation=(dilation,), dimension_numbers=("NCH", "OIH", "NCH"))
    return y + b[None, :, None]


def _ref_mrf(x, params, slope):
    lrelu = lambda v: jnp.where(v > 0, v, slope * v)
    outs = []
    for blk in params:
        h = x
        for (w1, b1, d), (w2, b2) in zip(blk["convs1"], blk["convs2"]):
            t = _ref_conv(lrelu(h), w1, b1, d)
            t = _ref_conv(lrelu(t), w2, b2, 1)
            h = t + h
        outs.append(h)
    return sum(outs) / len(outs)


# ----------------------------------------------------------------------------
if __name__ == "__main__":
    key = jax.random.PRNGKey(0)
    batch, n_channels, T = 2, 8, 128
    kernel_sizes = (3, 5)
    dilation_sizes = ((1, 3), (1, 3))

    key, xk, pk = jax.random.split(key, 3)
    x = jax.random.normal(xk, (batch, n_channels, T), jnp.float32)
    params = init_params(pk, n_channels, kernel_sizes, dilation_sizes)

    out = mrf_forward(x, params, LRELU_SLOPE)
    out = jax.block_until_ready(out)

    ref = _ref_mrf(x, params, LRELU_SLOPE)
    np.testing.assert_allclose(np.asarray(out), np.asarray(ref),
                               rtol=2e-4, atol=2e-4)
    print("KERNEL_OK")
</pallas_src>

<mosaic_0001>
module attributes {stable_mosaic.version = 11 : i64} {
  func.func @_mrf_kernel(%arg0: i32, %arg1: i32, %arg2: memref<1x1x8x152xf32, #tpu.memory_space<vmem>>, %arg3: memref<4x8x24xf32, #tpu.memory_space<vmem>>, %arg4: memref<4x8x1xf32, #tpu.memory_space<vmem>>, %arg5: memref<4x8x40xf32, #tpu.memory_space<vmem>>, %arg6: memref<4x8x1xf32, #tpu.memory_space<vmem>>, %arg7: memref<1x8x128xf32, #tpu.memory_space<vmem>>) attributes {dimension_semantics = [#tpu.dimension_semantics<parallel>, #tpu.dimension_semantics<parallel>], iteration_bounds = array<i64: 2, 1>, scalar_prefetch = 0 : i64, scratch_operands = 0 : i64, tpu.core_type = #tpu.core_type<tc>, window_params = [{transform_indices = @transform_0, window_bounds = array<i64: 1, 1, 8, 152>}, {pipeline_mode = #tpu.pipeline_mode<synchronous>, transform_indices = @transform_1, window_bounds = array<i64: 4, 8, 24>}, {pipeline_mode = #tpu.pipeline_mode<synchronous>, transform_indices = @transform_2, window_bounds = array<i64: 4, 8, 1>}, {pipeline_mode = #tpu.pipeline_mode<synchronous>, transform_indices = @transform_3, window_bounds = array<i64: 4, 8, 40>}, {pipeline_mode = #tpu.pipeline_mode<synchronous>, transform_indices = @transform_4, window_bounds = array<i64: 4, 8, 1>}, {transform_indices = @transform_5, window_bounds = array<i64: 1, 8, 128>}]} {
    %c128_i32 = arith.constant 128 : i32
    %0 = arith.muli %arg1, %c128_i32 : i32
    %c12_i32 = arith.constant 12 : i32
    %1 = arith.subi %0, %c12_i32 : i32
    %c0 = arith.constant 0 : index
    %c0_0 = arith.constant 0 : index
    %c0_1 = arith.constant 0 : index
    %c0_2 = arith.constant 0 : index
    %2 = vector.load %arg2[%c0, %c0_0, %c0_1, %c0_2] : memref<1x1x8x152xf32, #tpu.memory_space<vmem>>, vector<1x1x8x152xf32>
    %3 = vector.shape_cast %2 : vector<1x1x8x152xf32> to vector<8x152xf32>
    %cst = arith.constant 0.000000e+00 : f32
    %4 = vector.broadcast %cst : f32 to vector<8x128xf32>
    %cst_3 = arith.constant 0.000000e+00 : f32
    %5 = vector.broadcast %cst_3 : f32 to vector<8x152xf32>
    %6 = arith.cmpf ogt, %3, %5 : vector<8x152xf32>
    %cst_4 = arith.constant 1.000000e-01 : f32
    %7 = vector.broadcast %cst_4 : f32 to vector<8x152xf32>
    %8 = arith.mulf %7, %3 : vector<8x152xf32>
    %9 = arith.select %6, %3, %8 : vector<8x152xi1>, vector<8x152xf32>
    %c0_5 = arith.constant 0 : index
    %c0_6 = arith.constant 0 : index
    %c0_7 = arith.constant 0 : index
    %10 = vector.load %arg3[%c0_5, %c0_6, %c0_7] : memref<4x8x24xf32, #tpu.memory_space<vmem>>, vector<1x8x24xf32>
    %11 = vector.shape_cast %10 : vector<1x8x24xf32> to vector<8x24xf32>
    %c0_8 = arith.constant 0 : index
    %c0_9 = arith.constant 0 : index
    %c0_10 = arith.constant 0 : index
    %12 = vector.load %arg4[%c0_8, %c0_9, %c0_10] : memref<4x8x1xf32, #tpu.memory_space<vmem>>, vector<1x8x1xf32>
    %13 = vector.shape_cast %12 : vector<1x8x1xf32> to vector<8x1xf32>
    %14 = vector.extract_strided_slice %9 {offsets = [0, 0], sizes = [8, 150], strides = [1, 1]} : vector<8x152xf32> to vector<8x150xf32>
    %15 = vector.extract_strided_slice %9 {offsets = [0, 1], sizes = [8, 150], strides = [1, 1]} : vector<8x152xf32> to vector<8x150xf32>
    %16 = vector.extract_strided_slice %9 {offsets = [0, 2], sizes = [8, 150], strides = [1, 1]} : vector<8x152xf32> to vector<8x150xf32>
    %17 = tpu.concatenate %14, %15, %16 in 0 : vector<8x150xf32>, vector<8x150xf32>, vector<8x150xf32> -> vector<24x150xf32>
    %cst_11 = arith.constant dense<0.000000e+00> : vector<8x150xf32>
    %18 = tpu.matmul %11, %17, %cst_11 {dimension_numbers = #tpu.dot_dimension_numbers<[1], [0], [0], [1], [0, 0, 1, 1], [], []>} : vector<8x24xf32>, vector<24x150xf32>, vector<8x150xf32> -> vector<8x150xf32>
    %19 = vector.broadcast %13 : vector<8x1xf32> to vector<8x150xf32>
    %20 = arith.addf %18, %19 : vector<8x150xf32>
    %21 = tpu.iota {dimensions = array<i32: 1>} : vector<8x150xi32>
    %c1_i32 = arith.constant 1 : i32
    %22 = arith.addi %1, %c1_i32 : i32
    %23 = vector.broadcast %22 : i32 to vector<8x150xi32>
    %24 = arith.addi %21, %23 : vector<8x150xi32>
    %c0_i32 = arith.constant 0 : i32
    %25 = vector.broadcast %c0_i32 : i32 to vector<8x150xi32>
    %26 = arith.cmpi sge, %24, %25 : vector<8x150xi32>
    %c128_i32_12 = arith.constant 128 : i32
    %27 = vector.broadcast %c128_i32_12 : i32 to vector<8x150xi32>
    %28 = arith.cmpi slt, %24, %27 : vector<8x150xi32>
    %29 = arith.andi %26, %28 : vector<8x150xi1>
    %cst_13 = arith.constant 0.000000e+00 : f32
    %30 = vector.broadcast %cst_13 : f32 to vector<8x150xf32>
    %31 = arith.select %29, %20, %30 : vector<8x150xi1>, vector<8x150xf32>
    %cst_14 = arith.constant 0.000000e+00 : f32
    %32 = vector.broadcast %cst_14 : f32 to vector<8x150xf32>
    %33 = arith.cmpf ogt, %31, %32 : vector<8x150xf32>
    %cst_15 = arith.constant 1.000000e-01 : f32
    %34 = vector.broadcast %cst_15 : f32 to vector<8x150xf32>
    %35 = arith.mulf %34, %31 : vector<8x150xf32>
    %36 = arith.select %33, %31, %35 : vector<8x150xi1>, vector<8x150xf32>
    %c1 = arith.constant 1 : index
    %c0_16 = arith.constant 0 : index
    %c0_17 = arith.constant 0 : index
    %37 = vector.load %arg3[%c1, %c0_16, %c0_17] : memref<4x8x24xf32, #tpu.memory_space<vmem>>, vector<1x8x24xf32>
    %38 = vector.shape_cast %37 : vector<1x8x24xf32> to vector<8x24xf32>
    %c1_18 = arith.constant 1 : index
    %c0_19 = arith.constant 0 : index
    %c0_20 = arith.constant 0 : index
    %39 = vector.load %arg4[%c1_18, %c0_19, %c0_20] : memref<4x8x1xf32, #tpu.memory_space<vmem>>, vector<1x8x1xf32>
    %40 = vector.shape_cast %39 : vector<1x8x1xf32> to vector<8x1xf32>
    %41 = vector.extract_strided_slice %36 {offsets = [0, 0], sizes = [8, 148], strides = [1, 1]} : vector<8x150xf32> to vector<8x148xf32>
    %42 = vector.extract_strided_slice %36 {offsets = [0, 1], sizes = [8, 148], strides = [1, 1]} : vector<8x150xf32> to vector<8x148xf32>
    %43 = vector.extract_strided_slice %36 {offsets = [0, 2], sizes = [8, 148], strides = [1, 1]} : vector<8x150xf32> to vector<8x148xf32>
    %44 = tpu.concatenate %41, %42, %43 in 0 : vector<8x148xf32>, vector<8x148xf32>, vector<8x148xf32> -> vector<24x148xf32>
    %cst_21 = arith.constant dense<0.000000e+00> : vector<8x148xf32>
    %45 = tpu.matmul %38, %44, %cst_21 {dimension_numbers = #tpu.dot_dimension_numbers<[1], [0], [0], [1], [0, 0, 1, 1], [], []>} : vector<8x24xf32>, vector<24x148xf32>, vector<8x148xf32> -> vector<8x148xf32>
    %46 = vector.broadcast %40 : vector<8x1xf32> to vector<8x148xf32>
    %47 = arith.addf %45, %46 : vector<8x148xf32>
    %48 = vector.extract_strided_slice %3 {offsets = [0, 2], sizes = [8, 148], strides = [1, 1]} : vector<8x152xf32> to vector<8x148xf32>
    %49 = tpu.iota {dimensions = array<i32: 1>} : vector<8x148xi32>
    %c2_i32 = arith.constant 2 : i32
    %50 = arith.addi %1, %c2_i32 : i32
    %51 = vector.broadcast %50 : i32 to vector<8x148xi32>
    %52 = arith.addi %49, %51 : vector<8x148xi32>
    %c0_i32_22 = arith.constant 0 : i32
    %53 = vector.broadcast %c0_i32_22 : i32 to vector<8x148xi32>
    %54 = arith.cmpi sge, %52, %53 : vector<8x148xi32>
    %c128_i32_23 = arith.constant 128 : i32
    %55 = vector.broadcast %c128_i32_23 : i32 to vector<8x148xi32>
    %56 = arith.cmpi slt, %52, %55 : vector<8x148xi32>
    %57 = arith.andi %54, %56 : vector<8x148xi1>
    %58 = arith.addf %47, %48 : vector<8x148xf32>
    %cst_24 = arith.constant 0.000000e+00 : f32
    %59 = vector.broadcast %cst_24 : f32 to vector<8x148xf32>
    %60 = arith.select %57, %58, %59 : vector<8x148xi1>, vector<8x148xf32>
    %cst_25 = arith.constant 0.000000e+00 : f32
    %61 = vector.broadcast %cst_25 : f32 to vector<8x148xf32>
    %62 = arith.cmpf ogt, %60, %61 : vector<8x148xf32>
    %cst_26 = arith.constant 1.000000e-01 : f32
    %63 = vector.broadcast %cst_26 : f32 to vector<8x148xf32>
    %64 = arith.mulf %63, %60 : vector<8x148xf32>
    %65 = arith.select %62, %60, %64 : vector<8x148xi1>, vector<8x148xf32>
    %c2 = arith.constant 2 : index
    %c0_27 = arith.constant 0 : index
    %c0_28 = arith.constant 0 : index
    %66 = vector.load %arg3[%c2, %c0_27, %c0_28] : memref<4x8x24xf32, #tpu.memory_space<vmem>>, vector<1x8x24xf32>
    %67 = vector.shape_cast %66 : vector<1x8x24xf32> to vector<8x24xf32>
    %c2_29 = arith.constant 2 : index
    %c0_30 = arith.constant 0 : index
    %c0_31 = arith.constant 0 : index
    %68 = vector.load %arg4[%c2_29, %c0_30, %c0_31] : memref<4x8x1xf32, #tpu.memory_space<vmem>>, vector<1x8x1xf32>
    %69 = vector.shape_cast %68 : vector<1x8x1xf32> to vector<8x1xf32>
    %70 = vector.extract_strided_slice %65 {offsets = [0, 0], sizes = [8, 142], strides = [1, 1]} : vector<8x148xf32> to vector<8x142xf32>
    %71 = vector.extract_strided_slice %65 {offsets = [0, 3], sizes = [8, 142], strides = [1, 1]} : vector<8x148xf32> to vector<8x142xf32>
    %72 = vector.extract_strided_slice %65 {offsets = [0, 6], sizes = [8, 142], strides = [1, 1]} : vector<8x148xf32> to vector<8x142xf32>
    %73 = tpu.concatenate %70, %71, %72 in 0 : vector<8x142xf32>, vector<8x142xf32>, vector<8x142xf32> -> vector<24x142xf32>
    %cst_32 = arith.constant dense<0.000000e+00> : vector<8x142xf32>
    %74 = tpu.matmul %67, %73, %cst_32 {dimension_numbers = #tpu.dot_dimension_numbers<[1], [0], [0], [1], [0, 0, 1, 1], [], []>} : vector<8x24xf32>, vector<24x142xf32>, vector<8x142xf32> -> vector<8x142xf32>
    %75 = vector.broadcast %69 : vector<8x1xf32> to vector<8x142xf32>
    %76 = arith.addf %74, %75 : vector<8x142xf32>
    %77 = tpu.iota {dimensions = array<i32: 1>} : vector<8x142xi32>
    %c5_i32 = arith.constant 5 : i32
    %78 = arith.addi %1, %c5_i32 : i32
    %79 = vector.broadcast %78 : i32 to vector<8x142xi32>
    %80 = arith.addi %77, %79 : vector<8x142xi32>
    %c0_i32_33 = arith.constant 0 : i32
    %81 = vector.broadcast %c0_i32_33 : i32 to vector<8x142xi32>
    %82 = arith.cmpi sge, %80, %81 : vector<8x142xi32>
    %c128_i32_34 = arith.constant 128 : i32
    %83 = vector.broadcast %c128_i32_34 : i32 to vector<8x142xi32>
    %84 = arith.cmpi slt, %80, %83 : vector<8x142xi32>
    %85 = arith.andi %82, %84 : vector<8x142xi1>
    %cst_35 = arith.constant 0.000000e+00 : f32
    %86 = vector.broadcast %cst_35 : f32 to vector<8x142xf32>
    %87 = arith.select %85, %76, %86 : vector<8x142xi1>, vector<8x142xf32>
    %cst_36 = arith.constant 0.000000e+00 : f32
    %88 = vector.broadcast %cst_36 : f32 to vector<8x142xf32>
    %89 = arith.cmpf ogt, %87, %88 : vector<8x142xf32>
    %cst_37 = arith.constant 1.000000e-01 : f32
    %90 = vector.broadcast %cst_37 : f32 to vector<8x142xf32>
    %91 = arith.mulf %90, %87 : vector<8x142xf32>
    %92 = arith.select %89, %87, %91 : vector<8x142xi1>, vector<8x142xf32>
    %c3 = arith.constant 3 : index
    %c0_38 = arith.constant 0 : index
    %c0_39 = arith.constant 0 : index
    %93 = vector.load %arg3[%c3, %c0_38, %c0_39] : memref<4x8x24xf32, #tpu.memory_space<vmem>>, vector<1x8x24xf32>
    %94 = vector.shape_cast %93 : vector<1x8x24xf32> to vector<8x24xf32>
    %c3_40 = arith.constant 3 : index
    %c0_41 = arith.constant 0 : index
    %c0_42 = arith.constant 0 : index
    %95 = vector.load %arg4[%c3_40, %c0_41, %c0_42] : memref<4x8x1xf32, #tpu.memory_space<vmem>>, vector<1x8x1xf32>
    %96 = vector.shape_cast %95 : vector<1x8x1xf32> to vector<8x1xf32>
    %97 = vector.extract_strided_slice %92 {offsets = [0, 0], sizes = [8, 140], strides = [1, 1]} : vector<8x142xf32> to vector<8x140xf32>
    %98 = vector.extract_strided_slice %92 {offsets = [0, 1], sizes = [8, 140], strides = [1, 1]} : vector<8x142xf32> to vector<8x140xf32>
    %99 = vector.extract_strided_slice %92 {offsets = [0, 2], sizes = [8, 140], strides = [1, 1]} : vector<8x142xf32> to vector<8x140xf32>
    %100 = tpu.concatenate %97, %98, %99 in 0 : vector<8x140xf32>, vector<8x140xf32>, vector<8x140xf32> -> vector<24x140xf32>
    %cst_43 = arith.constant dense<0.000000e+00> : vector<8x140xf32>
    %101 = tpu.matmul %94, %100, %cst_43 {dimension_numbers = #tpu.dot_dimension_numbers<[1], [0], [0], [1], [0, 0, 1, 1], [], []>} : vector<8x24xf32>, vector<24x140xf32>, vector<8x140xf32> -> vector<8x140xf32>
    %102 = vector.broadcast %96 : vector<8x1xf32> to vector<8x140xf32>
    %103 = arith.addf %101, %102 : vector<8x140xf32>
    %104 = vector.extract_strided_slice %60 {offsets = [0, 4], sizes = [8, 140], strides = [1, 1]} : vector<8x148xf32> to vector<8x140xf32>
    %105 = tpu.iota {dimensions = array<i32: 1>} : vector<8x140xi32>
    %c6_i32 = arith.constant 6 : i32
    %106 = arith.addi %1, %c6_i32 : i32
    %107 = vector.broadcast %106 : i32 to vector<8x140xi32>
    %108 = arith.addi %105, %107 : vector<8x140xi32>
    %c0_i32_44 = arith.constant 0 : i32
    %109 = vector.broadcast %c0_i32_44 : i32 to vector<8x140xi32>
    %110 = arith.cmpi sge, %108, %109 : vector<8x140xi32>
    %c128_i32_45 = arith.constant 128 : i32
    %111 = vector.broadcast %c128_i32_45 : i32 to vector<8x140xi32>
    %112 = arith.cmpi slt, %108, %111 : vector<8x140xi32>
    %113 = arith.andi %110, %112 : vector<8x140xi1>
    %114 = arith.addf %103, %104 : vector<8x140xf32>
    %cst_46 = arith.constant 0.000000e+00 : f32
    %115 = vector.broadcast %cst_46 : f32 to vector<8x140xf32>
    %116 = arith.select %113, %114, %115 : vector<8x140xi1>, vector<8x140xf32>
    %117 = vector.extract_strided_slice %116 {offsets = [0, 6], sizes = [8, 128], strides = [1, 1]} : vector<8x140xf32> to vector<8x128xf32>
    %118 = arith.addf %4, %117 : vector<8x128xf32>
    %cst_47 = arith.constant 0.000000e+00 : f32
    %119 = vector.broadcast %cst_47 : f32 to vector<8x152xf32>
    %120 = arith.cmpf ogt, %3, %119 : vector<8x152xf32>
    %cst_48 = arith.constant 1.000000e-01 : f32
    %121 = vector.broadcast %cst_48 : f32 to vector<8x152xf32>
    %122 = arith.mulf %121, %3 : vector<8x152xf32>
    %123 = arith.select %120, %3, %122 : vector<8x152xi1>, vector<8x152xf32>
    %c0_49 = arith.constant 0 : index
    %c0_50 = arith.constant 0 : index
    %c0_51 = arith.constant 0 : index
    %124 = vector.load %arg5[%c0_49, %c0_50, %c0_51] : memref<4x8x40xf32, #tpu.memory_space<vmem>>, vector<1x8x40xf32>
    %125 = vector.shape_cast %124 : vector<1x8x40xf32> to vector<8x40xf32>
    %c0_52 = arith.constant 0 : index
    %c0_53 = arith.constant 0 : index
    %c0_54 = arith.constant 0 : index
    %126 = vector.load %arg6[%c0_52, %c0_53, %c0_54] : memref<4x8x1xf32, #tpu.memory_space<vmem>>, vector<1x8x1xf32>
    %127 = vector.shape_cast %126 : vector<1x8x1xf32> to vector<8x1xf32>
    %128 = vector.extract_strided_slice %123 {offsets = [0, 0], sizes = [8, 148], strides = [1, 1]} : vector<8x152xf32> to vector<8x148xf32>
    %129 = vector.extract_strided_slice %123 {offsets = [0, 1], sizes = [8, 148], strides = [1, 1]} : vector<8x152xf32> to vector<8x148xf32>
    %130 = vector.extract_strided_slice %123 {offsets = [0, 2], sizes = [8, 148], strides = [1, 1]} : vector<8x152xf32> to vector<8x148xf32>
    %131 = vector.extract_strided_slice %123 {offsets = [0, 3], sizes = [8, 148], strides = [1, 1]} : vector<8x152xf32> to vector<8x148xf32>
    %132 = vector.extract_strided_slice %123 {offsets = [0, 4], sizes = [8, 148], strides = [1, 1]} : vector<8x152xf32> to vector<8x148xf32>
    %133 = tpu.concatenate %128, %129, %130, %131, %132 in 0 : vector<8x148xf32>, vector<8x148xf32>, vector<8x148xf32>, vector<8x148xf32>, vector<8x148xf32> -> vector<40x148xf32>
    %cst_55 = arith.constant dense<0.000000e+00> : vector<8x148xf32>
    %134 = tpu.matmul %125, %133, %cst_55 {dimension_numbers = #tpu.dot_dimension_numbers<[1], [0], [0], [1], [0, 0, 1, 1], [], []>} : vector<8x40xf32>, vector<40x148xf32>, vector<8x148xf32> -> vector<8x148xf32>
    %135 = vector.broadcast %127 : vector<8x1xf32> to vector<8x148xf32>
    %136 = arith.addf %134, %135 : vector<8x148xf32>
    %137 = tpu.iota {dimensions = array<i32: 1>} : vector<8x148xi32>
    %c2_i32_56 = arith.constant 2 : i32
    %138 = arith.addi %1, %c2_i32_56 : i32
    %139 = vector.broadcast %138 : i32 to vector<8x148xi32>
    %140 = arith.addi %137, %139 : vector<8x148xi32>
    %c0_i32_57 = arith.constant 0 : i32
    %141 = vector.broadcast %c0_i32_57 : i32 to vector<8x148xi32>
    %142 = arith.cmpi sge, %140, %141 : vector<8x148xi32>
    %c128_i32_58 = arith.constant 128 : i32
    %143 = vector.broadcast %c128_i32_58 : i32 to vector<8x148xi32>
    %144 = arith.cmpi slt, %140, %143 : vector<8x148xi32>
    %145 = arith.andi %142, %144 : vector<8x148xi1>
    %cst_59 = arith.constant 0.000000e+00 : f32
    %146 = vector.broadcast %cst_59 : f32 to vector<8x148xf32>
    %147 = arith.select %145, %136, %146 : vector<8x148xi1>, vector<8x148xf32>
    %cst_60 = arith.constant 0.000000e+00 : f32
    %148 = vector.broadcast %cst_60 : f32 to vector<8x148xf32>
    %149 = arith.cmpf ogt, %147, %148 : vector<8x148xf32>
    %cst_61 = arith.constant 1.000000e-01 : f32
    %150 = vector.broadcast %cst_61 : f32 to vector<8x148xf32>
    %151 = arith.mulf %150, %147 : vector<8x148xf32>
    %152 = arith.select %149, %147, %151 : vector<8x148xi1>, vector<8x148xf32>
    %c1_62 = arith.constant 1 : index
    %c0_63 = arith.constant 0 : index
    %c0_64 = arith.constant 0 : index
    %153 = vector.load %arg5[%c1_62, %c0_63, %c0_64] : memref<4x8x40xf32, #tpu.memory_space<vmem>>, vector<1x8x40xf32>
    %154 = vector.shape_cast %153 : vector<1x8x40xf32> to vector<8x40xf32>
    %c1_65 = arith.constant 1 : index
    %c0_66 = arith.constant 0 : index
    %c0_67 = arith.constant 0 : index
    %155 = vector.load %arg6[%c1_65, %c0_66, %c0_67] : memref<4x8x1xf32, #tpu.memory_space<vmem>>, vector<1x8x1xf32>
    %156 = vector.shape_cast %155 : vector<1x8x1xf32> to vector<8x1xf32>
    %157 = vector.extract_strided_slice %152 {offsets = [0, 0], sizes = [8, 144], strides = [1, 1]} : vector<8x148xf32> to vector<8x144xf32>
    %158 = vector.extract_strided_slice %152 {offsets = [0, 1], sizes = [8, 144], strides = [1, 1]} : vector<8x148xf32> to vector<8x144xf32>
    %159 = vector.extract_strided_slice %152 {offsets = [0, 2], sizes = [8, 144], strides = [1, 1]} : vector<8x148xf32> to vector<8x144xf32>
    %160 = vector.extract_strided_slice %152 {offsets = [0, 3], sizes = [8, 144], strides = [1, 1]} : vector<8x148xf32> to vector<8x144xf32>
    %161 = vector.extract_strided_slice %152 {offsets = [0, 4], sizes = [8, 144], strides = [1, 1]} : vector<8x148xf32> to vector<8x144xf32>
    %162 = tpu.concatenate %157, %158, %159, %160, %161 in 0 : vector<8x144xf32>, vector<8x144xf32>, vector<8x144xf32>, vector<8x144xf32>, vector<8x144xf32> -> vector<40x144xf32>
    %cst_68 = arith.constant dense<0.000000e+00> : vector<8x144xf32>
    %163 = tpu.matmul %154, %162, %cst_68 {dimension_numbers = #tpu.dot_dimension_numbers<[1], [0], [0], [1], [0, 0, 1, 1], [], []>} : vector<8x40xf32>, vector<40x144xf32>, vector<8x144xf32> -> vector<8x144xf32>
    %164 = vector.broadcast %156 : vector<8x1xf32> to vector<8x144xf32>
    %165 = arith.addf %163, %164 : vector<8x144xf32>
    %166 = vector.extract_strided_slice %3 {offsets = [0, 4], sizes = [8, 144], strides = [1, 1]} : vector<8x152xf32> to vector<8x144xf32>
    %167 = tpu.iota {dimensions = array<i32: 1>} : vector<8x144xi32>
    %c4_i32 = arith.constant 4 : i32
    %168 = arith.addi %1, %c4_i32 : i32
    %169 = vector.broadcast %168 : i32 to vector<8x144xi32>
    %170 = arith.addi %167, %169 : vector<8x144xi32>
    %c0_i32_69 = arith.constant 0 : i32
    %171 = vector.broadcast %c0_i32_69 : i32 to vector<8x144xi32>
    %172 = arith.cmpi sge, %170, %171 : vector<8x144xi32>
    %c128_i32_70 = arith.constant 128 : i32
    %173 = vector.broadcast %c128_i32_70 : i32 to vector<8x144xi32>
    %174 = arith.cmpi slt, %170, %173 : vector<8x144xi32>
    %175 = arith.andi %172, %174 : vector<8x144xi1>
    %176 = arith.addf %165, %166 : vector<8x144xf32>
    %cst_71 = arith.constant 0.000000e+00 : f32
    %177 = vector.broadcast %cst_71 : f32 to vector<8x144xf32>
    %178 = arith.select %175, %176, %177 : vector<8x144xi1>, vector<8x144xf32>
    %cst_72 = arith.constant 0.000000e+00 : f32
    %179 = vector.broadcast %cst_72 : f32 to vector<8x144xf32>
    %180 = arith.cmpf ogt, %178, %179 : vector<8x144xf32>
    %cst_73 = arith.constant 1.000000e-01 : f32
    %181 = vector.broadcast %cst_73 : f32 to vector<8x144xf32>
    %182 = arith.mulf %181, %178 : vector<8x144xf32>
    %183 = arith.select %180, %178, %182 : vector<8x144xi1>, vector<8x144xf32>
    %c2_74 = arith.constant 2 : index
    %c0_75 = arith.constant 0 : index
    %c0_76 = arith.constant 0 : index
    %184 = vector.load %arg5[%c2_74, %c0_75, %c0_76] : memref<4x8x40xf32, #tpu.memory_space<vmem>>, vector<1x8x40xf32>
    %185 = vector.shape_cast %184 : vector<1x8x40xf32> to vector<8x40xf32>
    %c2_77 = arith.constant 2 : index
    %c0_78 = arith.constant 0 : index
    %c0_79 = arith.constant 0 : index
    %186 = vector.load %arg6[%c2_77, %c0_78, %c0_79] : memref<4x8x1xf32, #tpu.memory_space<vmem>>, vector<1x8x1xf32>
    %187 = vector.shape_cast %186 : vector<1x8x1xf32> to vector<8x1xf32>
    %188 = vector.extract_strided_slice %183 {offsets = [0, 0], sizes = [8, 132], strides = [1, 1]} : vector<8x144xf32> to vector<8x132xf32>
    %189 = vector.extract_strided_slice %183 {offsets = [0, 3], sizes = [8, 132], strides = [1, 1]} : vector<8x144xf32> to vector<8x132xf32>
    %190 = vector.extract_strided_slice %183 {offsets = [0, 6], sizes = [8, 132], strides = [1, 1]} : vector<8x144xf32> to vector<8x132xf32>
    %191 = vector.extract_strided_slice %183 {offsets = [0, 9], sizes = [8, 132], strides = [1, 1]} : vector<8x144xf32> to vector<8x132xf32>
    %192 = vector.extract_strided_slice %183 {offsets = [0, 12], sizes = [8, 132], strides = [1, 1]} : vector<8x144xf32> to vector<8x132xf32>
    %193 = tpu.concatenate %188, %189, %190, %191, %192 in 0 : vector<8x132xf32>, vector<8x132xf32>, vector<8x132xf32>, vector<8x132xf32>, vector<8x132xf32> -> vector<40x132xf32>
    %cst_80 = arith.constant dense<0.000000e+00> : vector<8x132xf32>
    %194 = tpu.matmul %185, %193, %cst_80 {dimension_numbers = #tpu.dot_dimension_numbers<[1], [0], [0], [1], [0, 0, 1, 1], [], []>} : vector<8x40xf32>, vector<40x132xf32>, vector<8x132xf32> -> vector<8x132xf32>
    %195 = vector.broadcast %187 : vector<8x1xf32> to vector<8x132xf32>
    %196 = arith.addf %194, %195 : vector<8x132xf32>
    %197 = tpu.iota {dimensions = array<i32: 1>} : vector<8x132xi32>
    %c10_i32 = arith.constant 10 : i32
    %198 = arith.addi %1, %c10_i32 : i32
    %199 = vector.broadcast %198 : i32 to vector<8x132xi32>
    %200 = arith.addi %197, %199 : vector<8x132xi32>
    %c0_i32_81 = arith.constant 0 : i32
    %201 = vector.broadcast %c0_i32_81 : i32 to vector<8x132xi32>
    %202 = arith.cmpi sge, %200, %201 : vector<8x132xi32>
    %c128_i32_82 = arith.constant 128 : i32
    %203 = vector.broadcast %c128_i32_82 : i32 to vector<8x132xi32>
    %204 = arith.cmpi slt, %200, %203 : vector<8x132xi32>
    %205 = arith.andi %202, %204 : vector<8x132xi1>
    %cst_83 = arith.constant 0.000000e+00 : f32
    %206 = vector.broadcast %cst_83 : f32 to vector<8x132xf32>
    %207 = arith.select %205, %196, %206 : vector<8x132xi1>, vector<8x132xf32>
    %cst_84 = arith.constant 0.000000e+00 : f32
    %208 = vector.broadcast %cst_84 : f32 to vector<8x132xf32>
    %209 = arith.cmpf ogt, %207, %208 : vector<8x132xf32>
    %cst_85 = arith.constant 1.000000e-01 : f32
    %210 = vector.broadcast %cst_85 : f32 to vector<8x132xf32>
    %211 = arith.mulf %210, %207 : vector<8x132xf32>
    %212 = arith.select %209, %207, %211 : vector<8x132xi1>, vector<8x132xf32>
    %c3_86 = arith.constant 3 : index
    %c0_87 = arith.constant 0 : index
    %c0_88 = arith.constant 0 : index
    %213 = vector.load %arg5[%c3_86, %c0_87, %c0_88] : memref<4x8x40xf32, #tpu.memory_space<vmem>>, vector<1x8x40xf32>
    %214 = vector.shape_cast %213 : vector<1x8x40xf32> to vector<8x40xf32>
    %c3_89 = arith.constant 3 : index
    %c0_90 = arith.constant 0 : index
    %c0_91 = arith.constant 0 : index
    %215 = vector.load %arg6[%c3_89, %c0_90, %c0_91] : memref<4x8x1xf32, #tpu.memory_space<vmem>>, vector<1x8x1xf32>
    %216 = vector.shape_cast %215 : vector<1x8x1xf32> to vector<8x1xf32>
    %217 = vector.extract_strided_slice %212 {offsets = [0, 0], sizes = [8, 128], strides = [1, 1]} : vector<8x132xf32> to vector<8x128xf32>
    %218 = vector.extract_strided_slice %212 {offsets = [0, 1], sizes = [8, 128], strides = [1, 1]} : vector<8x132xf32> to vector<8x128xf32>
    %219 = vector.extract_strided_slice %212 {offsets = [0, 2], sizes = [8, 128], strides = [1, 1]} : vector<8x132xf32> to vector<8x128xf32>
    %220 = vector.extract_strided_slice %212 {offsets = [0, 3], sizes = [8, 128], strides = [1, 1]} : vector<8x132xf32> to vector<8x128xf32>
    %221 = vector.extract_strided_slice %212 {offsets = [0, 4], sizes = [8, 128], strides = [1, 1]} : vector<8x132xf32> to vector<8x128xf32>
    %222 = tpu.concatenate %217, %218, %219, %220, %221 in 0 : vector<8x128xf32>, vector<8x128xf32>, vector<8x128xf32>, vector<8x128xf32>, vector<8x128xf32> -> vector<40x128xf32>
    %cst_92 = arith.constant dense<0.000000e+00> : vector<8x128xf32>
    %223 = tpu.matmul %214, %222, %cst_92 {dimension_numbers = #tpu.dot_dimension_numbers<[1], [0], [0], [1], [0, 0, 1, 1], [], []>} : vector<8x40xf32>, vector<40x128xf32>, vector<8x128xf32> -> vector<8x128xf32>
    %224 = vector.broadcast %216 : vector<8x1xf32> to vector<8x128xf32>
    %225 = arith.addf %223, %224 : vector<8x128xf32>
    %226 = vector.extract_strided_slice %178 {offsets = [0, 8], sizes = [8, 128], strides = [1, 1]} : vector<8x144xf32> to vector<8x128xf32>
    %227 = tpu.iota {dimensions = array<i32: 1>} : vector<8x128xi32>
    %c12_i32_93 = arith.constant 12 : i32
    %228 = arith.addi %1, %c12_i32_93 : i32
    %229 = vector.broadcast %228 : i32 to vector<8x128xi32>
    %230 = arith.addi %227, %229 : vector<8x128xi32>
    %c0_i32_94 = arith.constant 0 : i32
    %231 = vector.broadcast %c0_i32_94 : i32 to vector<8x128xi32>
    %232 = arith.cmpi sge, %230, %231 : vector<8x128xi32>
    %c128_i32_95 = arith.constant 128 : i32
    %233 = vector.broadcast %c128_i32_95 : i32 to vector<8x128xi32>
    %234 = arith.cmpi slt, %230, %233 : vector<8x128xi32>
    %235 = arith.andi %232, %234 : vector<8x128xi1>
    %236 = arith.addf %225, %226 : vector<8x128xf32>
    %cst_96 = arith.constant 0.000000e+00 : f32
    %237 = vector.broadcast %cst_96 : f32 to vector<8x128xf32>
    %238 = arith.select %235, %236, %237 : vector<8x128xi1>, vector<8x128xf32>
    %239 = arith.addf %118, %238 : vector<8x128xf32>
    %cst_97 = arith.constant 5.000000e-01 : f32
    %240 = vector.broadcast %cst_97 : f32 to vector<8x128xf32>
    %241 = arith.mulf %239, %240 : vector<8x128xf32>
    %c0_98 = arith.constant 0 : index
    %c0_99 = arith.constant 0 : index
    %c0_100 = arith.constant 0 : index
    %242 = vector.load %arg7[%c0_98, %c0_99, %c0_100] : memref<1x8x128xf32, #tpu.memory_space<vmem>>, vector<1x8x128xf32>
    %243 = vector.shape_cast %242 : vector<1x8x128xf32> to vector<8x128xf32>
    %244 = vector.shape_cast %241 : vector<8x128xf32> to vector<1x8x128xf32>
    tpu.vector_store %arg7[%c0_98, %c0_99, %c0_100], %244 {strides = array<i32>} : memref<1x8x128xf32, #tpu.memory_space<vmem>>, vector<1x8x128xf32>,
    return
  }
  func.func @transform_0(%arg0: i32, %arg1: i32) -> (i32, i32, i32, i32) {
    %c0_i32 = arith.constant 0 : i32
    %c0_i32_0 = arith.constant 0 : i32
    %c0_i32_1 = arith.constant 0 : i32
    return %arg0, %arg1, %c0_i32, %c0_i32_0 : i32, i32, i32, i32
  }
  func.func @transform_1(%arg0: i32, %arg1: i32) -> (i32, i32, i32) {
    %c0_i32 = arith.constant 0 : i32
    %c0_i32_0 = arith.constant 0 : i32
    %c0_i32_1 = arith.constant 0 : i32
    %c0_i32_2 = arith.constant 0 : i32
    return %c0_i32, %c0_i32_0, %c0_i32_1 : i32, i32, i32
  }
  func.func @transform_2(%arg0: i32, %arg1: i32) -> (i32, i32, i32) {
    %c0_i32 = arith.constant 0 : i32
    %c0_i32_0 = arith.constant 0 : i32
    %c0_i32_1 = arith.constant 0 : i32
    %c0_i32_2 = arith.constant 0 : i32
    return %c0_i32, %c0_i32_0, %c0_i32_1 : i32, i32, i32
  }
  func.func @transform_3(%arg0: i32, %arg1: i32) -> (i32, i32, i32) {
    %c0_i32 = arith.constant 0 : i32
    %c0_i32_0 = arith.constant 0 : i32
    %c0_i32_1 = arith.constant 0 : i32
    %c0_i32_2 = arith.constant 0 : i32
    return %c0_i32, %c0_i32_0, %c0_i32_1 : i32, i32, i32
  }
  func.func @transform_4(%arg0: i32, %arg1: i32) -> (i32, i32, i32) {
    %c0_i32 = arith.constant 0 : i32
    %c0_i32_0 = arith.constant 0 : i32
    %c0_i32_1 = arith.constant 0 : i32
    %c0_i32_2 = arith.constant 0 : i32
    return %c0_i32, %c0_i32_0, %c0_i32_1 : i32, i32, i32
  }
  func.func @transform_5(%arg0: i32, %arg1: i32) -> (i32, i32, i32) {
    %c0_i32 = arith.constant 0 : i32
    %c0_i32_0 = arith.constant 0 : i32
    return %arg0, %c0_i32, %arg1 : i32, i32, i32
  }
}

</mosaic_0001>

<bundles_post_ra>
// kernel: tpu_custom_call.1
= control target key start
LH: loop header
LB: loop body
LE: loop exit
PB: predicated region body
PF: predicated region fallthrough
CT: control target
= control target key end

     0   :  { %10 = vsyncpa [#allocation3], 0  ;;  %s2169_s0 = inlined_call_operand.vmem [shape: f32[2,1,8,152], index: 0, kind: input, shape index: {}]   ;;  %s2170_s1 = inlined_call_operand.vmem [shape: f32[4,8,24], index: 1, kind: input, shape index: {}]   ;;  %s2171_s2 = inlined_call_operand.vmem [shape: f32[4,8,1], index: 2, kind: input, shape index: {}]   ;;  %s2172_s3 = inlined_call_operand.hbm [shape: f32[4,8,40], index: 3, kind: input, shape index: {}]   ;;  %s2173_s4 = inlined_call_operand.vmem [shape: f32[4,8,1], index: 4, kind: input, shape index: {}]   ;;  %s2174_s5 = inlined_call_operand.hbm [shape: f32[2,8,128], index: 5, kind: output, shape index: {}]  }
   0x1   :  { %11 = vsyncpa [#allocation4], 0 }
   0x2   :  { %13 = vsyncpa [#allocation4 + $0x1], 0  ;;  %s1799_s18 = smov 0   ;;  %s1801_s19 = smov 0  }
   0x3   :  { %s1803_s20 = smov 0   ;;  %s1805_s21 = smov 0  }
   0x4   :  { %s1807_s22 = smov 0   ;;  %s1809_s23 = smov 0  }
   0x5 LB: > { %s1390_s24 = sadd.s32 4294967295, %s1750_s23   ;;  %s1391_s25 = sadd.s32 4294967294, %s1750_s23   ;;  %s1750_s23 = sphi %s1809_s23, %s19_s23   ;;  %s1746_s22 = sphi %s1807_s22, %s2192_s22   ;;  %s1742_s21 = sphi %s1805_s21, %s2191_s21   ;;  %s1738_s20 = sphi %s1803_s20, %s2190_s20   ;;  %s1734_s19 = sphi %s1801_s19, %s2189_s19   ;;  %s1730_s18 = sphi %s1799_s18, %s2188_s18  }
   0x6   : > { %s31_s26 = sadd.s32 1, %s1746_s22  ;;  %s152_s27 = sadd.s32 1, %s1738_s20 }
   0x7   : > { %p33_p0 = scmp.ge.s32.totalorder %s31_s26, 2  ;;  %p162_p1 = scmp.ne.s32.totalorder %s1738_s20, %s1734_s19 }
   0x8   : > { %p163_p2 = scmp.eq.s32.totalorder %s1390_s24, 1  ;;  %p168_p3 = scmp.ne.s32.totalorder %s1734_s19, %s1730_s18 }
   0x9   : > { %s2194_s26 = smov (%p33_p0, %s31_s26), 0  ;;  %p169_p5 = scmp.eq.s32.totalorder %s1391_s25, 1 }
   0xa   : > { %p1839_p4 = por %p163_p2, %p162_p1  ;;  %s147_s29 = ssub.s32 %s1746_s22, %s2194_s26 }
   0xb   : > { %p1392_p6 = scmp.ge.s32.totalorder %s1750_s23, 1  ;;  %p150_p7 = scmp.eq.s32.totalorder %s147_s29, 0 }
   0xc   : > { %s2179_s28 = scalar_select %p1839_p4, 1, 0 }
   0xd   : > { %p1846_p8 = por %p169_p5, %p168_p3  ;;  %p176_p9 = scmp.lt.s32.totalorder %s1750_s23, 3 }
   0xe   : > { %s1852_s6 = scalar_select %p150_p7, %s1738_s20, %s152_s27  }
   0xf   : > { %s2180_s30 = scalar_select %p1846_p8, 1, 0 }
  0x10   : > { %p1854_p10 = pnand %p1392_p6, %p176_p9  ;;  %p1858_p11 = scmp.eq.s32.totalorder %s1390_s24, 0 }
  0x11   : > { %s1752_s9 = smov [#allocation2]   ;;  %s1640_s14 = scalar_lea.hbm %s2172_s3, 512 }
  0x12   : > { %s2181_s7 = scalar_select %p1854_p10, 1, 0 }
  0x13   : > { %s2182_s8 = scalar_select %p1858_p11, 1, 0 }
  0x14   : > { %p1493_p12 = pneg %p1854_p10  ;;  %s194_s10 = sshll.u32 %s1752_s9, 4  ;;  %s195_s10 = int_to_ptr.vmem [resolvable:$true] %s194_s10 }
  0x15   : > { %p1641_p0 = scmp.ne.s32.totalorder %s2172_s3, %s1640_s14  ;;  %p1647_p5 = scmp.lt.u32.totalorder %s1640_s14, %s2172_s3 }
  0x16   : > { %p1866_p13 = pnand %p1858_p11, %p1493_p12 }
  0x18   : > { %p1642_p1 = pneg %p1866_p13 }
  0x1a   : > { %p1643_p2 = pnand %p1642_p1, %p1641_p0 }
  0x1c   : > { %p1644_p3 = pneg %p1643_p2 }
  0x1e   : > { %p1649_p6 = pnand %p1647_p5, %p1644_p3 }
  0x20   : > { %1652 = shalt.err (!%p1649_p6)
}
  0x21   : > { %s1653_s25 = scalar_lea.vmem %s195_s10, 512  ;;  %p1661_p8 = scmp.lt.s32.totalorder %s195_s10, %s195_s10 }
  0x22   : > { %p1654_p7 = scmp.ne.s32.totalorder %s195_s10, %s1653_s25  ;;  %p1662_p4 = scmp.lt.s32.totalorder %s1653_s25, %s1653_s25 }
  0x24   : > { %p1656_p9 = pnand %p1654_p7, %p1642_p1  ;;  %p1663_p11 = por %p1662_p4, %p1661_p8 }
  0x26   : > { %p1657_p12 = pneg %p1656_p9 }
  0x28   : > { %p1664_p10 = pnand %p1663_p11, %p1657_p12 }
  0x2a   : > { %1667 = shalt.err (!%p1664_p10)
}
  0x2b   : > { %s1753_s27 = smov 128   ;;  %s1754_s29 = smov 8  }
  0x2c   : > { %1496 = dma.hbm_to_vmem [thread:$0]  (!%p1866_p13), %s2172_s3, 512, %s195_s10, [#allocation3], %s1753_s27, %s1753_s27, %s1754_s29  }
  0x2d   : > { %p2184_p0 = scmp.ne.s32.totalorder %s2181_s7, 0 }
  0x2e   : > { %p2185_p2 = scmp.ne.s32.totalorder (!%p2184_p0), %s2182_s8, 0 }
  0x2f   : > { %225 = sbr.rel (%p2184_p0) target bundleno = 2413 (0x96d), region = 40 }
  0x36   : > { %1721 = dma.done.wait (%p2185_p2), [#allocation3], 512  }
  0x37   : > { %1723 = vsyncadd (%p2185_p2), [#allocation3], 4294966784  ;;  %p257_p4 = scmp.lt.s32.totalorder %s1742_s21, 1  ;;  %v1755_v6 = vmov 0.0   ;;  %s1756_s7 = smov 126   ;;  %v1757_v8 = vmov 0   ;;  %v375_v20 = vlaneseq }
  0x38   : > { %368 = vmatprep.mubr.f32.mxu0 %v1755_v6  ;;  %488 = vmatprep.mubr.f32.mxu1 %v1755_v6  ;;  %v276_v9 = vld [vmem:[%s2171_s2] sm:$0xff]  ;;  %s1758_s17 = smov 127   ;;  %vm283_vm2 = vcmask 1039360   ;;  %vm291_vm3 = vcmask 1031168   ;;  %vm300_vm4 = vcmask 195584   ;;  %v1402_v37 = vld [vmem:[%s2171_s2 + $0x8] sm:$0xff] }
  0x39   : > { %s258_s13 = scalar_select %p257_p4, %s1742_s21, 1  ;;  %1589 = vset.pattern.permute.xlu0 %v1757_v8  ;;  %1573 = vset.pattern.permute.xlu1 %v1757_v8  ;;  %v275_v19 = vld [vmem:[%s2170_s1] sm:$0xff]  ;;  %v1948_v21 = vand.u32 127, %v375_v20  ;;  %v1401_v46 = vld [vmem:[%s2170_s1 + $0x8] sm:$0xff]  ;;  %vm534_vm13 = vcmask 1022976   ;;  %vm542_vm14 = vcmask 998400  }
  0x3a   : > { %s1761_s15 = smov 124   ;;  %vm758_vm15 = vcmask 1014784   ;;  %s1762_s11 = smov 116  }
  0x3b   : > { %s1421_s14 = sshll.u32 %s258_s13, 4  ;;  %v1951_v22 = vadd.s32 128, %v1948_v21  ;;  %v380_v23 = vadd.s32 4294967285, %v1948_v21  ;;  %v1973_v51 = vadd.s32 4294967286, %v1948_v21  ;;  %s1759_s13 = smov 122  }
  0x3c   : > { %s265_s16 = scalar_lea.vmem %s2169_s0, %s1421_s14  ;;  %s1760_s14 = smov 125  }
  0x3d   : > { %v1897_v0 = vld [vmem:[%s265_s16] sm:$0xff]  ;;  %v1899_v1 = vld [vmem:[%s265_s16 + $0x8] sm:$0xff]  ;;  %v381_v24 = vadd.s32 4294967285, %v1951_v22  ;;  %vm382_vm5 = vcmp.ge.s32.totalorder %v380_v23, 0  ;;  %v1976_v52 = vadd.s32 4294967286, %v1951_v22  ;;  %vm499_vm9 = vcmp.ge.s32.totalorder %v1973_v51, 0 }
  0x3e   : > { %vm269_vm0 = vcmp.gt.f32.partialorder %v1897_v0, 0.0  ;;  %vm270_vm1 = vcmp.gt.f32.partialorder %v1899_v1, 0.0  ;;  %v271_v2 = vmul.f32 0.1, %v1897_v0  ;;  %v272_v3 = vmul.f32 0.1, %v1899_v1 }
  0x3f   : > { %vm385_vm6 = vcmp.lt.s32.totalorder %v381_v24, 128  ;;  %vm502_vm10 = vcmp.lt.s32.totalorder %v1976_v52, 128  ;;  %v1411_v51 = vld [vmem:[%s2173_s4 + $0x8] sm:$0xff]  ;;  %s1763_s16 = smov 119   ;;  %s1766_s27 = smov 120  }
  0x40   : > { %v1906_v4 = vsel %vm269_vm0, %v1897_v0, %v271_v2  ;;  %v1909_v5 = vsel %vm270_vm1, %v1899_v1, %v272_v3  ;;  %vm789_vm0 = vcmask 326656   ;;  %s1418_s9 = sshll.u32 %s1742_s21, 7  ;;  %p2186_p10 = scmp.ne.s32.totalorder %s2179_s28, 0 }
  0x41   : > { %v1915_v7 = vpack.i.bf16 %v1909_v5, %v1906_v4  ;;  %289 = vrot.lane.b32.xlu1 %v1909_v5, %s1756_s7  ;;  %s2121_s10 = scalar_lea.hbm %s2174_s5, %s1418_s9  ;;  %s1768_s21 = smov [#allocation5]  }
  0x42   : > { %s1672_s25 = sshll.u32 %s1768_s21, 4  ;;  %s1673_s25 = int_to_ptr.vmem [resolvable:$false] %s1672_s25 }
  0x43   : > { %1569 = vrot.lane.b32.xlu0 %v1915_v7, %s1758_s17 }
  0x45   : > { %297 = vperm.xlu1 %1573, %v276_v9   ;;  %v769_v9 = vld [vmem:[%s2173_s4] sm:$0xff] }
  0x47   : > { %287 = vrot.lane.b32.xlu0 %v1906_v4, %s1756_s7 }
  0xb3   : > { %v1933_v16 = vpop.permute.xlu1 %289 }
  0xb5   : > { %v1570_v10 = vpop.permute.xlu0 %1569 }
  0xb6   : > { %v1572_v11 = vunpack.i.h.bf16 %v1570_v10  ;;  %v1571_v12 = vunpack.i.l.bf16 %v1570_v10  ;;  %v1405_v10 = vld [vmem:[%s2171_s2 + $0x10] sm:$0xff] }
  0xb8   : > { %v1927_v13 = vpack.c.bf16 %v1572_v11, %v1909_v5  ;;  %v284_v14 = vsel %vm283_vm2, %v1571_v12, %v1572_v11 }
  0xb9   : > { %v1931_v15 = vpack.c.bf16 %v284_v14, %v1906_v4  ;;  %v288_v17 = vpop.permute.xlu0 %287 }
  0xba   : > { %1442 = vmatprep.subr.bf16.mxu0 %v1927_v13  ;;  %v1940_v18 = vsel %vm291_vm3, %v288_v17, %v1933_v16 }
  0xbb   : > { %1444 = vmatpush1.bf16.msra.mxu0 %v1931_v15 }
  0xbc   : > { %308 = vmatprep.subr.mxu0 %v1933_v16 }
  0xbf   : > { %309 = vmatpush1.msra.mxu0 %v1940_v18 }
  0xc0   : > { %1400 = vmatmul.mubr.msk.f32.vlgmr.msra.gmra.mrb[0].mxu0 %vm300_vm4, %v275_v19 }
  0xc1   : > { %618 = vmatprep.mubr.f32.mxu0 %v1755_v6 }
  0xc4   : > { %v298_v25 = vpop.permute.xlu1 %297 }
 0x193   : > { %v370_v26 = vpop.f32.mrb[0].mxu0 }
 0x194   : > { %v371_v27 = vadd.f32 %v370_v26, %v298_v25  ;;  %v372_v28 = vpop.f32.mrb[1].mxu0 }
 0x195   : > { %v373_v29 = vadd.f32 %v372_v28, %v298_v25  ;;  %v1404_v25 = vld [vmem:[%s2170_s1 + $0x10] sm:$0xff] }
 0x196   : > { %v388_v30 = vsel %vm382_vm5, %v371_v27, 0.0 }
 0x197   : > { %v392_v31 = vmul.f32 0.1, %v388_v30  ;;  %v389_v32 = vsel %vm385_vm6, %v373_v29, 0.0  ;;  %vm390_vm7 = vcmp.gt.f32.partialorder %v388_v30, 0.0 }
 0x198   : > { %vm391_vm8 = vcmp.gt.f32.partialorder %v389_v32, 0.0  ;;  %v393_v33 = vmul.f32 0.1, %v389_v32 }
 0x199   : > { %v394_v34 = vsel %vm390_vm7, %v388_v30, %v392_v31 }
 0x19a   : > { %v395_v35 = vsel %vm391_vm8, %v389_v32, %v393_v33  ;;  %409 = vrot.lane.b32.xlu1 %v394_v34, %s1756_s7 }
 0x19b   : > { %v1574_v36 = vpack.i.bf16 %v395_v35, %v394_v34 }
 0x19d   : > { %1575 = vrot.lane.b32.xlu0 %v1574_v36, %s1758_s17 }
 0x19e   : > { %418 = vperm.xlu1 %1573, %v1402_v37  }
 0x1a1   : > { %411 = vrot.lane.b32.xlu0 %v395_v35, %s1756_s7 }
 0x1a2   : > { %509 = vrot.lane.b32.xlu1 %v1899_v1, %s1756_s7 }
 0x1a5   : > { %507 = vrot.lane.b32.xlu0 %v1897_v0, %s1756_s7 }
 0x20c   : > { %v410_v45 = vpop.permute.xlu1 %409 }
 0x20f   : > { %v1576_v38 = vpop.permute.xlu0 %1575 }
 0x210   : > { %v1578_v39 = vunpack.i.h.bf16 %v1576_v38  ;;  %v1577_v40 = vunpack.i.l.bf16 %v1576_v38 }
 0x212   : > { %v1445_v41 = vpack.c.bf16 %v1578_v39, %v395_v35  ;;  %v406_v42 = vsel %vm283_vm2, %v1577_v40, %v1578_v39 }
 0x213   : > { %v1447_v43 = vpack.c.bf16 %v406_v42, %v394_v34  ;;  %v412_v44 = vpop.permute.xlu0 %411 }
 0x214   : > { %1446 = vmatprep.subr.bf16.mxu1 %v1445_v41  ;;  %v413_v47 = vsel %vm291_vm3, %v410_v45, %v412_v44 }
 0x215   : > { %1448 = vmatpush1.bf16.msra.mxu1 %v1447_v43 }
 0x216   : > { %428 = vmatprep.subr.mxu1 %v412_v44 }
 0x217   : > { %v508_v50 = vpop.permute.xlu0 %507 }
 0x219   : > { %429 = vmatpush1.msra.mxu1 %v413_v47 }
 0x21a   : > { %1403 = vmatmul.mubr.msk.f32.vlgmr.msra.gmra.mrb[0].mxu1 %vm300_vm4, %v1401_v46 }
 0x21b   : > { %735 = vmatprep.mubr.f32.mxu1 %v1755_v6 }
 0x21d   : > { %v419_v48 = vpop.permute.xlu1 %418 }
 0x221   : > { %v510_v49 = vpop.permute.xlu1 %509 }
 0x222   : > { %v511_v54 = vsel %vm291_vm3, %v508_v50, %v510_v49 }
 0x2ed   : > { %v490_v53 = vpop.f32.mrb[0].mxu1 }
 0x2ee   : > { %v491_v55 = vadd.f32 %v490_v53, %v419_v48  ;;  %v492_v56 = vpop.f32.mrb[1].mxu1 }
 0x2ef   : > { %v493_v57 = vadd.f32 %v492_v56, %v419_v48 }
 0x2f0   : > { %v514_v58 = vadd.f32 %v511_v54, %v491_v55 }
 0x2f1   : > { %v515_v59 = vadd.f32 %v510_v49, %v493_v57 }
 0x2f2   : > { %v1983_v60 = vsel %vm499_vm9, %v514_v58, 0.0 }
 0x2f3   : > { %v1987_v61 = vsel %vm502_vm10, %v515_v59, 0.0  ;;  %vm518_vm11 = vcmp.gt.f32.partialorder %v1983_v60, 0.0  ;;  %v520_v62 = vmul.f32 0.1, %v1983_v60 }
 0x2f4   : > { %v521_v63 = vmul.f32 0.1, %v1987_v61  ;;  %vm519_vm12 = vcmp.gt.f32.partialorder %v1987_v61, 0.0 }
 0x2f5   : > { %v522_v2 = vsel %vm518_vm11, %v1983_v60, %v520_v62 }
 0x2f6   : > { %538 = vrot.lane.b32.xlu1 %v522_v2, %s1759_s13  ;;  %v523_v3 = vsel %vm519_vm12, %v1987_v61, %v521_v63 }
 0x2f7   : > { %v1579_v8 = vpack.i.bf16 %v523_v3, %v522_v2 }
 0x2f9   : > { %1580 = vrot.lane.b32.xlu0 %v1579_v8, %s1760_s14 }
 0x2fa   : > { %1585 = vrot.lane.b32.xlu1 %v1915_v7, %s1760_s14 }
 0x2fd   : > { %540 = vrot.lane.b32.xlu0 %v523_v3, %s1759_s13 }
 0x2fe   : > { %779 = vrot.lane.b32.xlu1 %v1909_v5, %s1761_s15 }
 0x301   : > { %777 = vrot.lane.b32.xlu0 %v1906_v4, %s1761_s15 }
 0x302   : > { %786 = vperm.xlu1 %1573, %v769_v9   ;;  %v1407_v9 = vld [vmem:[%s2170_s1 + $0x18] sm:$0xff] }
 0x305   : > { %548 = vperm.xlu0 %1589, %v1405_v10  }
 0x368   : > { %v539_v7 = vpop.permute.xlu1 %538 }
 0x36b   : > { %v1581_v11 = vpop.permute.xlu0 %1580 }
 0x36c   : > { %v1583_v12 = vunpack.i.h.bf16 %v1581_v11  ;;  %v1582_v14 = vunpack.i.l.bf16 %v1581_v11  ;;  %v1586_v20 = vpop.permute.xlu1 %1585 }
 0x36d   : > { %v1588_v4 = vunpack.i.h.bf16 %v1586_v20  ;;  %v1587_v24 = vunpack.i.l.bf16 %v1586_v20 }
 0x36e   : > { %v1449_v17 = vpack.c.bf16 %v1583_v12, %v523_v3  ;;  %v535_v5 = vsel %vm534_vm13, %v1582_v14, %v1583_v12 }
 0x36f   : > { %v1451_v19 = vpack.c.bf16 %v535_v5, %v522_v2  ;;  %v541_v23 = vpop.permute.xlu0 %540  ;;  %v1461_v27 = vpack.c.bf16 %v1588_v4, %v1933_v16  ;;  %v774_v28 = vsel %vm534_vm13, %v1587_v24, %v1588_v4  ;;  %v768_v16 = vld [vmem:[#allocation2] sm:$0xff] }
 0x370   : > { %1450 = vmatprep.subr.bf16.mxu0 %v1449_v17  ;;  %v543_v26 = vsel %vm542_vm14, %v539_v7, %v541_v23  ;;  %v1463_v29 = vpack.c.bf16 %v774_v28, %v1940_v18  ;;  %v780_v30 = vpop.permute.xlu1 %779 }
 0x371   : > { %1452 = vmatpush1.bf16.msra.mxu0 %v1451_v19 }
 0x372   : > { %558 = vmatprep.subr.mxu0 %v541_v23 }
 0x373   : > { %v778_v31 = vpop.permute.xlu0 %777 }
 0x374   : > { %v781_v32 = vsel %vm758_vm15, %v778_v31, %v780_v30 }
 0x375   : > { %559 = vmatpush1.msra.mxu0 %v543_v26 }
 0x376   : > { %1406 = vmatmul.mubr.msk.f32.vlgmr.msra.gmra.mrb[2].mxu0 %vm300_vm4, %v1404_v25  ;;  %1458 = vmatprep.subr.bf16.mxu0 %v1927_v13  ;;  %v627_v13 = vadd.s32 4294967289, %v1948_v21 }
 0x377   : > { %1460 = vmatpush1.bf16.msra.mxu0 %v1931_v15  ;;  %857 = vmatprep.mubr.f32.mxu0 %v1755_v6  ;;  %v628_v15 = vadd.s32 4294967289, %v1951_v22 }
 0x378   : > { %1462 = vmatprep.subr.bf16.mxu0 %v1461_v27  ;;  %vm629_vm1 = vcmp.ge.s32.totalorder %v627_v13, 0 }
 0x379   : > { %vm632_vm5 = vcmp.lt.s32.totalorder %v628_v15, 128 }
 0x37b   : > { %1464 = vmatpush1.bf16.msra.mxu0 %v1463_v29 }
 0x37c   : > { %801 = vmatprep.subr.mxu0 %v780_v30  ;;  %v873_v30 = vld [vmem:[#allocation2 + $0x8] sm:$0xff] }
 0x37f   : > { %802 = vmatpush1.msra.mxu0 %v781_v32 }
 0x380   : > { %1410 = vmatmul.mubr.msk.f32.vlgmr.msra.gmra.mrb[4].mxu0 %vm789_vm0, %v768_v16 }
 0x381   : > { %1120 = vmatprep.mubr.f32.mxu0 %v1755_v6  ;;  %v787_v44 = vpop.permute.xlu1 %786 }
 0x384   : > { %v549_v33 = vpop.permute.xlu0 %548 }
 0x449   : > { %v620_v18 = vpop.f32.mrb[2].mxu0 }
 0x44a   : > { %v621_v34 = vadd.f32 %v620_v18, %v549_v33  ;;  %v622_v35 = vpop.f32.mrb[3].mxu0  ;;  %v987_v18 = vadd.s32 4294967288, %v1948_v21 }
 0x44b   : > { %v623_v36 = vadd.f32 %v622_v35, %v549_v33 }
 0x44c   : > { %v635_v37 = vsel %vm629_vm1, %v621_v34, 0.0  ;;  %v988_v34 = vadd.s32 4294967288, %v1951_v22  ;;  %vm1036_vm1 = vcmask 973824  }
 0x44d   : > { %v639_v38 = vmul.f32 0.1, %v635_v37  ;;  %v636_v39 = vsel %vm632_vm5, %v623_v36, 0.0  ;;  %vm637_vm6 = vcmp.gt.f32.partialorder %v635_v37, 0.0  ;;  %vm1044_vm5 = vcmask 949248  }
 0x44e   : > { %vm638_vm7 = vcmp.gt.f32.partialorder %v636_v39, 0.0  ;;  %v640_v40 = vmul.f32 0.1, %v636_v39 }
 0x44f   : > { %v641_v41 = vsel %vm637_vm6, %v635_v37, %v639_v38 }
 0x450   : > { %v642_v42 = vsel %vm638_vm7, %v636_v39, %v640_v40  ;;  %656 = vrot.lane.b32.xlu0 %v641_v41, %s1756_s7 }
 0x451   : > { %v1590_v43 = vpack.i.bf16 %v642_v42, %v641_v41 }
 0x453   : > { %v859_v45 = vpop.f32.mrb[4].mxu0  ;;  %1591 = vrot.lane.b32.xlu1 %v1590_v43, %s1758_s17 }
 0x454   : > { %v860_v46 = vadd.f32 %v859_v45, %v787_v44  ;;  %v861_v47 = vpop.f32.mrb[5].mxu0 }
 0x455   : > { %v862_v48 = vadd.f32 %v861_v47, %v787_v44 }
 0x456   : > { %v864_v49 = vsel %vm499_vm9, %v860_v46, 0.0  ;;  %vm992_vm9 = vcmp.lt.s32.totalorder %v988_v34, 128 }
 0x457   : > { %vm866_vm8 = vcmp.gt.f32.partialorder %v864_v49, 0.0  ;;  %v868_v50 = vmul.f32 0.1, %v864_v49  ;;  %v865_v53 = vsel %vm502_vm10, %v862_v48, 0.0  ;;  %658 = vrot.lane.b32.xlu1 %v642_v42, %s1756_s7 }
 0x458   : > { %vm867_vm11 = vcmp.gt.f32.partialorder %v865_v53, 0.0  ;;  %v869_v54 = vmul.f32 0.1, %v865_v53 }
 0x459   : > { %v870_v55 = vsel %vm866_vm8, %v864_v49, %v868_v50  ;;  %v1413_v49 = vld [vmem:[%s2173_s4 + $0x10] sm:$0xff] }
 0x45a   : > { %v871_v56 = vsel %vm867_vm11, %v865_v53, %v869_v54 }
 0x45b   : > { %v1595_v57 = vpack.i.bf16 %v871_v56, %v870_v55 }
 0x45d   : > { %1596 = vrot.lane.b32.xlu0 %v1595_v57, %s1758_s17  ;;  %1601 = vrot.lane.b32.xlu1 %v1595_v57, %s1756_s7 }
 0x461   : > { %1606 = vrot.lane.b32.xlu0 %v1595_v57, %s1760_s14  ;;  %899 = vrot.lane.b32.xlu1 %v870_v55, %s1761_s15 }
 0x465   : > { %901 = vrot.lane.b32.xlu0 %v871_v56, %s1761_s15  ;;  %908 = vperm.xlu1 %1573, %v1411_v51  }
 0x469   : > { %995 = vrot.lane.b32.xlu0 %v1897_v0, %s1761_s15  ;;  %997 = vrot.lane.b32.xlu1 %v1899_v1, %s1761_s15 }
 0x4c2   : > { %v657_v3 = vpop.permute.xlu0 %656 }
 0x4c5   : > { %v1592_v52 = vpop.permute.xlu1 %1591 }
 0x4c6   : > { %v1594_v58 = vunpack.i.h.bf16 %v1592_v52  ;;  %v1593_v59 = vunpack.i.l.bf16 %v1592_v52 }
 0x4c8   : > { %v1453_v62 = vpack.c.bf16 %v1594_v58, %v642_v42  ;;  %v653_v63 = vsel %vm283_vm2, %v1593_v59, %v1594_v58 }
 0x4c9   : > { %v1455_v2 = vpack.c.bf16 %v653_v63, %v641_v41  ;;  %v659_v8 = vpop.permute.xlu1 %658 }
 0x4ca   : > { %1454 = vmatprep.subr.bf16.mxu1 %v1453_v62  ;;  %v660_v0 = vsel %vm291_vm3, %v657_v3, %v659_v8 }
 0x4cb   : > { %1456 = vmatpush1.bf16.msra.mxu1 %v1455_v2 }
 0x4cc   : > { %675 = vmatprep.subr.mxu1 %v659_v8 }
 0x4cf   : > { %v1597_v10 = vpop.permute.xlu0 %1596  ;;  %v1602_v1 = vpop.permute.xlu1 %1601  ;;  %676 = vmatpush1.msra.mxu1 %v660_v0 }
 0x4d0   : > { %v1599_v7 = vunpack.i.h.bf16 %v1597_v10  ;;  %v1598_v11 = vunpack.i.l.bf16 %v1597_v10  ;;  %1409 = vmatmul.mubr.msk.f32.vlgmr.msra.gmra.mrb[2].mxu1 %vm300_vm4, %v1407_v9  ;;  %v1604_v17 = vunpack.i.h.bf16 %v1602_v1  ;;  %v1603_v5 = vunpack.i.l.bf16 %v1602_v1  ;;  %v1013_v1 = vld [vmem:[#allocation2 + $0x10] sm:$0xff] }
 0x4d1   : > { %978 = vmatprep.mubr.f32.mxu1 %v1755_v6  ;;  %vm989_vm4 = vcmp.ge.s32.totalorder %v987_v18, 0 }
 0x4d2   : > { %v1465_v12 = vpack.c.bf16 %v1599_v7, %v871_v56  ;;  %v882_v14 = vsel %vm283_vm2, %v1598_v11, %v1599_v7  ;;  %v889_v24 = vsel %vm291_vm3, %v1603_v5, %v1604_v17  ;;  %v1129_v11 = vadd.s32 4294967294, %v1948_v21 }
 0x4d3   : > { %v1467_v19 = vpack.c.bf16 %v882_v14, %v870_v55  ;;  %v1607_v20 = vpop.permute.xlu0 %1606  ;;  %v900_v29 = vpop.permute.xlu1 %899 }
 0x4d4   : > { %v1609_v23 = vunpack.i.h.bf16 %v1607_v20  ;;  %v1608_v4 = vunpack.i.l.bf16 %v1607_v20  ;;  %1466 = vmatprep.subr.bf16.mxu1 %v1465_v12  ;;  %v1130_v12 = vadd.s32 4294967294, %v1951_v22  ;;  %vm1131_vm6 = vcmp.ge.s32.totalorder %v1129_v11, 0 }
 0x4d5   : > { %1468 = vmatpush1.bf16.msra.mxu1 %v1467_v19  ;;  %v1764_v20 = vmov 0.0|0.0  }
 0x4d6   : > { %v896_v25 = vsel %vm534_vm13, %v1608_v4, %v1609_v23  ;;  %v1469_v26 = vpack.c.bf16 %v1609_v23, %v1604_v17  ;;  %vm1134_vm7 = vcmp.lt.s32.totalorder %v1130_v12, 128 }
 0x4d7   : > { %v1471_v27 = vpack.c.bf16 %v896_v25, %v889_v24  ;;  %v902_v28 = vpop.permute.xlu0 %901 }
 0x4d8   : > { %1470 = vmatprep.subr.bf16.mxu1 %v1469_v26  ;;  %v903_v31 = vsel %vm758_vm15, %v900_v29, %v902_v28 }
 0x4d9   : > { %1472 = vmatpush1.bf16.msra.mxu1 %v1471_v27 }
 0x4da   : > { %922 = vmatprep.subr.mxu1 %v902_v28 }
 0x4db   : > { %v996_v15 = vpop.permute.xlu0 %995 }
 0x4dd   : > { %923 = vmatpush1.msra.mxu1 %v903_v31  ;;  %v1408_v31 = vld [vmem:[%s2171_s2 + $0x18] sm:$0xff] }
 0x4de   : > { %1412 = vmatmul.mubr.msk.f32.vlgmr.msra.gmra.mrb[4].mxu1 %vm789_vm0, %v873_v30  ;;  %1481 = vmatprep.subr.bf16.mxu1 %v1764_v20  ;;  %v1415_v30 = vld [vmem:[%s2173_s4 + $0x18] sm:$0xff] }
 0x4e4   : > { %v909_v13 = vpop.permute.xlu1 %908 }
 0x4e8   : > { %v998_v33 = vpop.permute.xlu1 %997 }
 0x4e9   : > { %v999_v36 = vsel %vm758_vm15, %v996_v15, %v998_v33 }
 0x5a3   : > { %v2058_v32 = vpop.f32.mrb[2].mxu1 }
 0x5a4   : > { %v2060_v16 = vpop.f32.mrb[3].mxu1 }
 0x5b1   : > { %v980_v35 = vpop.f32.mrb[4].mxu1 }
 0x5b2   : > { %v981_v37 = vadd.f32 %v980_v35, %v909_v13  ;;  %v982_v38 = vpop.f32.mrb[5].mxu1 }
 0x5b3   : > { %v983_v39 = vadd.f32 %v982_v38, %v909_v13 }
 0x5b4   : > { %v1002_v40 = vadd.f32 %v999_v36, %v981_v37 }
 0x5b5   : > { %v1003_v41 = vadd.f32 %v998_v33, %v983_v39 }
 0x5b6   : > { %v2065_v42 = vsel %vm989_vm4, %v1002_v40, 0.0  ;;  %vm1765_vm4 = vmmov 0  }
 0x5b7   : > { %vm1006_vm10 = vcmp.gt.f32.partialorder %v2065_v42, 0.0  ;;  %v1008_v43 = vmul.f32 0.1, %v2065_v42  ;;  %v2069_v44 = vsel %vm992_vm9, %v1003_v41, 0.0  ;;  %1438 = vmatprep.mubr.msk.f32.mxu1 %vm1765_vm4, %v1755_v6 }
 0x5b8   : > { %vm1007_vm12 = vcmp.gt.f32.partialorder %v2069_v44, 0.0  ;;  %v1009_v45 = vmul.f32 0.1, %v2069_v44 }
 0x5b9   : > { %v1010_v46 = vsel %vm1006_vm10, %v2065_v42, %v1008_v43 }
 0x5ba   : > { %v1011_v47 = vsel %vm1007_vm12, %v2069_v44, %v1009_v45 }
 0x5bb   : > { %v1615_v48 = vpack.i.bf16 %v1011_v47, %v1010_v46 }
 0x5bd   : > { %1616 = vrot.lane.b32.xlu1 %v1615_v48, %s1759_s13  ;;  %1611 = vrot.lane.b32.xlu0 %v1615_v48, %s1760_s14 }
 0x5c1   : > { %1040 = vrot.lane.b32.xlu1 %v1010_v46, %s1762_s11  ;;  %1621 = vrot.lane.b32.xlu0 %v1615_v48, %s1763_s16 }
 0x5c5   : > { %1050 = vperm.xlu1 %1573, %v1413_v49   ;;  %1042 = vrot.lane.b32.xlu0 %v1011_v47, %s1762_s11 }
 0x62f   : > { %v1617_v50 = vpop.permute.xlu1 %1616  ;;  %v1612_v53 = vpop.permute.xlu0 %1611 }
 0x630   : > { %v1614_v54 = vunpack.i.h.bf16 %v1612_v53  ;;  %v1613_v55 = vunpack.i.l.bf16 %v1612_v53  ;;  %v1619_v56 = vunpack.i.h.bf16 %v1617_v50  ;;  %v1618_v57 = vunpack.i.l.bf16 %v1617_v50 }
 0x632   : > { %v1473_v51 = vpack.c.bf16 %v1614_v54, %v1011_v47  ;;  %v1022_v52 = vsel %vm534_vm13, %v1613_v55, %v1614_v54  ;;  %v1029_v2 = vsel %vm542_vm14, %v1618_v57, %v1619_v56 }
 0x633   : > { %v1475_v58 = vpack.c.bf16 %v1022_v52, %v1010_v46  ;;  %v1622_v59 = vpop.permute.xlu0 %1621  ;;  %v1041_v10 = vpop.permute.xlu1 %1040  ;;  %v744_v52 = vadd.s32 4294967290, %v1948_v21 }
 0x634   : > { %v1624_v62 = vunpack.i.h.bf16 %v1622_v59  ;;  %v1623_v63 = vunpack.i.l.bf16 %v1622_v59  ;;  %1474 = vmatprep.subr.bf16.mxu0 %v1473_v51 }
 0x635   : > { %1476 = vmatpush1.bf16.msra.mxu0 %v1475_v58  ;;  %v745_v58 = vadd.s32 4294967290, %v1951_v22 }
 0x636   : > { %v1477_v3 = vpack.c.bf16 %v1624_v62, %v1619_v56  ;;  %v1037_v8 = vsel %vm1036_vm1, %v1623_v63, %v1624_v62 }
 0x637   : > { %v1479_v9 = vpack.c.bf16 %v1037_v8, %v1029_v2  ;;  %v1043_v0 = vpop.permute.xlu0 %1042 }
 0x638   : > { %1478 = vmatprep.subr.bf16.mxu0 %v1477_v3  ;;  %v1045_v7 = vsel %vm1044_vm5, %v1041_v10, %v1043_v0 }
 0x639   : > { %1480 = vmatpush1.bf16.msra.mxu0 %v1479_v9 }
 0x63a   : > { %1064 = vmatprep.subr.mxu0 %v1043_v0 }
 0x63d   : > { %1065 = vmatpush1.msra.mxu0 %v1045_v7 }
 0x63e   : > { %1414 = vmatmul.mubr.msk.f32.vlgmr.msra.gmra.mrb[6].mxu0 %vm789_vm0, %v1013_v1 }
 0x644   : > { %v1051_v14 = vpop.permute.xlu1 %1050 }
 0x711   : > { %v1122_v17 = vpop.f32.mrb[6].mxu0 }
 0x712   : > { %v1123_v5 = vadd.f32 %v1122_v17, %v1051_v14  ;;  %v1124_v19 = vpop.f32.mrb[7].mxu0 }
 0x713   : > { %v1125_v23 = vadd.f32 %v1124_v19, %v1051_v14 }
 0x714   : > { %v1137_v4 = vsel %vm1131_vm6, %v1123_v5, 0.0 }
 0x715   : > { %vm1139_vm8 = vcmp.gt.f32.partialorder %v1137_v4, 0.0  ;;  %v1141_v24 = vmul.f32 0.1, %v1137_v4  ;;  %v1138_v25 = vsel %vm1134_vm7, %v1125_v23, 0.0 }
 0x716   : > { %vm1140_vm11 = vcmp.gt.f32.partialorder %v1138_v25, 0.0  ;;  %v1142_v26 = vmul.f32 0.1, %v1138_v25 }
 0x717   : > { %v1143_v27 = vsel %vm1139_vm8, %v1137_v4, %v1141_v24 }
 0x718   : > { %v1144_v28 = vsel %vm1140_vm11, %v1138_v25, %v1142_v26 }
 0x719   : > { %v1630_v29 = vpack.i.bf16 %v1144_v28, %v1143_v27 }
 0x71b   : > { %1631 = vrot.lane.b32.xlu1 %v1630_v29, %s1756_s7  ;;  %1626 = vrot.lane.b32.xlu0 %v1630_v29, %s1758_s17 }
 0x71f   : > { %1169 = vrot.lane.b32.xlu1 %v1143_v27, %s1761_s15  ;;  %1636 = vrot.lane.b32.xlu0 %v1630_v29, %s1760_s14  ;;  %s1767_s14 = smov 6  }
 0x723   : > { %1177 = vperm.xlu1 %1573, %v1415_v30   ;;  %1171 = vrot.lane.b32.xlu0 %v1144_v28, %s1761_s15 }
 0x727   : > { %1262 = vrot.lane.b32.xlu1 %v2069_v44, %s1766_s27  ;;  %1260 = vrot.lane.b32.xlu0 %v2065_v42, %s1766_s27  ;;  %v1146_v44 = vld [vmem:[#allocation2 + $0x18] sm:$0xff]  ;;  %s1674_s27 = scalar_lea.vmem %s1673_s25, 256 }
 0x72b   : > { %754 = vrot.lane.b32.xlu1 %v1983_v60, %s1761_s15  ;;  %665 = vperm.xlu0 %1589, %v1408_v31  }
 0x72f   : > { %756 = vrot.lane.b32.xlu0 %v1987_v61, %s1761_s15  ;;  %s254_s15 = sand.u32 1, %s1734_s19  }
 0x730   : > { %s1397_s29 = sshll.u32 %s254_s15, 3 }
 0x731   : > { %s256_s12 = scalar_lea.vmem [#allocation5], %s1397_s29 }
 0x732   : > { %s1301_s11 = sshll.u32 %s256_s12, 4  ;;  %s2123_s11 = int_to_ptr.vmem [resolvable:$true] %s1301_s11 }
 0x733   : > { %s1668_s24 = scalar_lea.vmem %s2123_s11, 128  ;;  %p1675_p1 = scmp.lt.s32.totalorder %s2123_s11, %s1673_s25 }
 0x734   : > { %p1669_p8 = scmp.ne.s32.totalorder %s2123_s11, %s1668_s24  ;;  %p1676_p3 = scmp.lt.s32.totalorder %s1674_s27, %s1668_s24 }
 0x736   : > { %p1670_p11 = pnand %p1669_p8, %p2186_p10  ;;  %p1677_p5 = por %p1676_p3, %p1675_p1 }
 0x738   : > { %p1671_p13 = pneg %p1670_p11 }
 0x73a   : > { %p1678_p6 = pnand %p1677_p5, %p1671_p13 }
 0x78d   : > { %v1632_v13 = vpop.permute.xlu1 %1631  ;;  %v1627_v15 = vpop.permute.xlu0 %1626 }
 0x78e   : > { %v1629_v33 = vunpack.i.h.bf16 %v1627_v15  ;;  %v1628_v18 = vunpack.i.l.bf16 %v1627_v15  ;;  %v1634_v34 = vunpack.i.h.bf16 %v1632_v13  ;;  %v1633_v35 = vunpack.i.l.bf16 %v1632_v13 }
 0x790   : > { %v1155_v36 = vsel %vm283_vm2, %v1628_v18, %v1629_v33  ;;  %v1161_v41 = vsel %vm291_vm3, %v1633_v35, %v1634_v34  ;;  %vm1264_vm2 = vcmask 982016   ;;  %vm746_vm3 = vcmp.ge.s32.totalorder %v744_v52, 0 }
 0x791   : > { %v1482_v37 = vpack.c.bf16 %v1155_v36, %v1143_v27  ;;  %v1637_v38 = vpop.permute.xlu0 %1636  ;;  %v1170_v43 = vpop.permute.xlu1 %1169 }
 0x792   : > { %v1639_v39 = vunpack.i.h.bf16 %v1637_v38  ;;  %v1638_v40 = vunpack.i.l.bf16 %v1637_v38 }
 0x793   : > { %1483 = vmatpush3.bf16.msra.mxu1 %v1482_v37 }
 0x794   : > { %v1167_v60 = vsel %vm534_vm13, %v1638_v40, %v1639_v39  ;;  %1484 = vmatprep.subr.bf16.mxu1 %v1764_v20  ;;  %vm749_vm13 = vcmp.lt.s32.totalorder %v745_v58, 128 }
 0x795   : > { %v1485_v42 = vpack.c.bf16 %v1167_v60, %v1161_v41  ;;  %v1172_v61 = vpop.permute.xlu0 %1171 }
 0x796   : > { %v1173_v45 = vsel %vm758_vm15, %v1170_v43, %v1172_v61 }
 0x797   : > { %1486 = vmatpush3.bf16.msra.mxu1 %v1485_v42 }
 0x798   : > { %1436 = vmatprep.subr.mxu1 %v1755_v6 }
 0x799   : > { %v1261_v49 = vpop.permute.xlu0 %1260 }
 0x79b   : > { %1437 = vmatpush3.msra.mxu1 %v1173_v45 }
 0x79c   : > { %1439 = vmatmul.mubr.msk.f32.vlgmr.msra.gmra.mrb[6].mxu1 %vm789_vm0, %v1146_v44 }
 0x7a2   : > { %v1178_v46 = vpop.permute.xlu1 %1177 }
 0x7a6   : > { %v1263_v47 = vpop.permute.xlu1 %1262 }
 0x7a7   : > { %v1265_v54 = vsel %vm1264_vm2, %v1261_v49, %v1263_v47 }
 0x7aa   : > { %v666_v56 = vpop.permute.xlu0 %665  ;;  %v755_v57 = vpop.permute.xlu1 %754 }
 0x7ab   : > { %v738_v59 = vadd.f32 %v2058_v32, %v666_v56  ;;  %v740_v62 = vadd.f32 %v2060_v16, %v666_v56 }
 0x7ae   : > { %v757_v6 = vpop.permute.xlu0 %756 }
 0x7af   : > { %v759_v51 = vsel %vm758_vm15, %v755_v57, %v757_v6  ;;  %v763_v2 = vadd.f32 %v757_v6, %v740_v62 }
 0x7b0   : > { %v762_v63 = vadd.f32 %v759_v51, %v738_v59 }
 0x7b1   : > { %v765_v8 = vsel %vm749_vm13, %v763_v2, 0.0 }
 0x7b2   : > { %v764_v3 = vsel %vm746_vm3, %v762_v63, 0.0 }
 0x86f   : > { %v1249_v48 = vpop.f32.mrb[6].mxu1 }
 0x870   : > { %v1250_v50 = vadd.f32 %v1249_v48, %v1178_v46  ;;  %v1440_v53 = vpop.f32.mrb[7].mxu1 }
 0x872   : > { %v1267_v55 = vadd.f32 %v1265_v54, %v1250_v50 }
 0x874   : > { %1270 = vrot.lane.b32.xlu1 %v1267_v55, %s1767_s14 }
 0x8e6   : > { %v1271_v9 = vpop.permute.xlu1 %1270 }
 0x8e7   : > { %v1273_v0 = vadd.f32 %v1271_v9, %v764_v3  ;;  %v1274_v10 = vadd.f32 %v1271_v9, %v765_v8 }
 0x8e9   : > { %v1275_v1 = vmul.f32 0.5, %v1273_v0  ;;  %v1276_v7 = vmul.f32 0.5, %v1274_v10 }
 0x8eb   : > { %1281 = vrot.lane.b32.xlu1 %v1276_v7, %s1759_s13  ;;  %1279 = vrot.lane.b32.xlu0 %v1275_v1, %s1759_s13  ;;  %s1287_s13 = scalar_lea.sflag [#allocation4], %s254_s15 }
 0x95d   : > { %v1282_v21 = vpop.permute.xlu1 %1281  ;;  %v1280_v22 = vpop.permute.xlu0 %1279 }
 0x95e   : > { %v1283_v32 = vsel %vm542_vm14, %v1280_v22, %v1282_v21 }
 0x95f   : > { %1285 = vst [vmem:[%s256_s12] sm:$0xff] %v1283_v32 }
 0x960   : > { %1681 = shalt.err (!%p1678_p6)
}
 0x961   : > { %s1682_s7 = scalar_lea.hbm %s2121_s10, 128  ;;  %s1686_s15 = scalar_lea.hbm %s2174_s5, 256 }
 0x962   : > { %p1683_p7 = scmp.ne.s32.totalorder %s2121_s10, %s1682_s7  ;;  %p1687_p0 = scmp.lt.u32.totalorder %s2121_s10, %s2174_s5 }
 0x963   : > { %p1688_p2 = scmp.lt.u32.totalorder %s1686_s15, %s1682_s7  ;;  %p1690_p8 = scmp.lt.u32.totalorder %s1682_s7, %s2121_s10 }
 0x964   : > { %p1684_p9 = pnand %p1683_p7, %p2186_p10 }
 0x965   : > { %p1689_p4 = por %p1688_p2, %p1687_p0 }
 0x966   : > { %p1685_p12 = pneg %p1684_p9 }
 0x967   : > { %p1691_p11 = por %p1690_p8, %p1689_p4 }
 0x969   : > { %p1692_p13 = pnand %p1691_p11, %p1685_p12 }
 0x96b   : > { %1695 = shalt.err (!%p1692_p13)
}
 0x96c   : > { %1491 = dma.vmem_to_hbm [thread:$0]  (%p2186_p10), %s2123_s11, 128, %s2121_s10, %s1287_s13  }
 0x96d PF: > { %p1503_p1 = scmp.ge.s32.totalorder %s1750_s23, 2  ;;  %s1313_s12 = sand.u32 1, %s1730_s18  }
 0x96e   : > { %p2187_p3 = scmp.ne.s32.totalorder %s2180_s30, 0  ;;  %s1314_s16 = scalar_lea.sflag [#allocation4], %s1313_s12 }
 0x970   : > { %p1498_p5 = pnand %p1503_p1, %p2187_p3 }
 0x972   : > { %1725 = dma.done.wait (!%p1498_p5), %s1314_s16, 128  }
 0x973   : > { %1727 = vsyncadd (!%p1498_p5), %s1314_s16, 4294967168  ;;  %s19_s23 = sadd.s32 1, %s1750_s23   ;;  %s2188_s18 = smov %s1734_s19 }
 0x974   : > { %p16_p6 = scmp.ge.s32.totalorder %s19_s23, 4   ;;  %s2189_s19 = smov %s1738_s20 }
 0x975   : > { %s2190_s20 = smov %s1852_s6  ;;  %s2191_s21 = smov %s1746_s22 }
 0x976   : > { %s2192_s22 = smov %s2194_s26  ;;  %18 = sbr.rel (!%p16_p6) target bundleno = 5 (0x5), region = 92 }
 0x97d   :  { %1319 = vsyncpa [#allocation3], 1 }
 0x97e   :  { %1321 = vsyncpa [#allocation3 + $0x1], 1 }
 0x97f   :  { %1322 = vsyncpa [#allocation4], 1 }
 0x980   :  { %1324 = vsyncpa [#allocation4 + $0x1], 1 }

</bundles_post_ra>
